<compile_context>
chip_gen: v6e
topology: v6e:2x2x1
jax: 0.10.0
libtpu: 0.0.40
codegen_flags: <defaults>
</compile_context>

<pallas_src>
import jax
import jax.numpy as jnp
from jax.experimental import pallas as pl
from jax.experimental.pallas import tpu as pltpu


_LANES = 128      # vreg lane width
_SUBLANES = 8     # vreg sublanes (f32)
_TR_MAX = 2048    # rows per tile -> 2048*128 = 256K batch elements per step
_MIN_GRID = 4     # aim for >= 4 tiles so both v7x TensorCores get work


def _round_up(x: int, m: int) -> int:
    return (x + m - 1) // m * m


def _linear_kernel(x_ref, w_ref, b_ref, o_ref):
    """o[n] = bias[n] + sum_k w[n, k] * x[k]   per (rows, 128) plane, pure VPU.

    x_ref: (in_dim, TR, 128)  batch-on-lanes, sublane-dense tile (VMEM)
    w_ref: (out_dim, in_dim)  SMEM scalars
    b_ref: (out_dim,)         SMEM scalars
    o_ref: (out_dim, TR, 128)

    Math is done in float32 regardless of the streamed dtype; the cast happens
    only at the store.  NOTE: lanes/rows beyond the true batch size contain
    bias-only garbage -- callers must slice them off (the wrappers below do).
    """
    out_dim, in_dim = w_ref.shape           # static (4, 2)
    x = [x_ref[k].astype(jnp.float32) for k in range(in_dim)]   # (TR,128) planes
    for n in range(out_dim):
        acc = b_ref[n] + w_ref[n, 0] * x[0]
        for k in range(1, in_dim):
            acc = acc + w_ref[n, k] * x[k]
        o_ref[n] = acc.astype(o_ref.dtype)   # per-plane store, no concat


def _pick_tile_rows(rows: int, tr_max: int) -> int:
    """Rows per tile: multiple of 8, <= tr_max, >= _MIN_GRID tiles if possible."""
    target = max(_SUBLANES, _round_up(pl.cdiv(rows, _MIN_GRID), _SUBLANES))
    return min(tr_max, rows, target)


def qnetwork_apply_lane_major(x_t, weight, bias, *, tr_max=_TR_MAX):
    """Core entry point, lane-dense end to end (no layout round-trips).

    x_t:    (in_dim, B)   batch on the minor (lane) axis
    weight: (out_dim, in_dim)  (PyTorch nn.Linear convention)
    bias:   (out_dim,)
    returns (out_dim, B)  same batch-minor layout
    """
    in_dim, B = x_t.shape
    out_dim = weight.shape[0]
    weight = weight.astype(jnp.float32)
    bias = bias.astype(jnp.float32)

    # Pad batch only to one (8,128)-vreg worth of elements, NOT to a multiple
    # of the tile; a ragged last tile is handled by the grid.
    b_pad = _round_up(max(B, 1), _SUBLANES * _LANES)
    if b_pad != B:
        x_t = jnp.pad(x_t, ((0, 0), (0, b_pad - B)))
    rows = b_pad // _LANES                    # multiple of 8

    tr = _pick_tile_rows(rows, tr_max)
    grid = (pl.cdiv(rows, tr),)

    # Free row-major reshape to the sublane-dense 3D layout.
    x3 = x_t.reshape(in_dim, rows, _LANES)

    out3 = pl.pallas_call(
        _linear_kernel,
        out_shape=jax.ShapeDtypeStruct((out_dim, rows, _LANES), x_t.dtype),
        grid=grid,
        in_specs=[
            pl.BlockSpec((in_dim, tr, _LANES), lambda i: (0, i, 0)),   # streamed x
            pl.BlockSpec(memory_space=pltpu.MemorySpace.SMEM),         # weight scalars
            pl.BlockSpec(memory_space=pltpu.MemorySpace.SMEM),         # bias scalars
        ],
        out_specs=pl.BlockSpec((out_dim, tr, _LANES), lambda i: (0, i, 0)),
        compiler_params=pltpu.CompilerParams(
            dimension_semantics=("parallel",),
            # (in+out) tiles, double-buffered: ~12 MiB at tr=2048.  32 MiB is
            # legal on v5e/v6e (128 MiB phys) and v7x (64 MiB phys).
            vmem_limit_bytes=32 * 1024 * 1024,
        ),
    )(x3, weight, bias)

    # Padded batch positions hold bias-only values -> slice them off.
    return out3.reshape(out_dim, rows * _LANES)[:, :B]


def qnetwork_forward(state, weight, bias):
    """PyTorch-convention forward: state (B, in) -> (B, out).

    NOTE: the transposes here are each an extra HBM pass on a purely
    bandwidth-bound op; prefer qnetwork_apply_lane_major when the surrounding
    pipeline is already batch-minor, and plain XLA for a tiny standalone call.
    """
    out_t = qnetwork_apply_lane_major(state.T, weight, bias)
    return out_t.T


def init_qnetwork_params(key, input_size, output_size):
    """Deterministic init mimicking PyTorch nn.Linear default U(+-1/sqrt(in))."""
    k_w, k_b = jax.random.split(key)
    bound = 1.0 / jnp.sqrt(jnp.float32(input_size))
    weight = jax.random.uniform(
        k_w, (output_size, input_size), jnp.float32, minval=-bound, maxval=bound
    )
    bias = jax.random.uniform(
        k_b, (output_size,), jnp.float32, minval=-bound, maxval=bound
    )
    return weight, bias


if __name__ == "__main__":
    input_size = 2
    output_size = 4

    key = jax.random.PRNGKey(0)
    k_params, k_x, k_x2, k_x3 = jax.random.split(key, 4)
    weight, bias = init_qnetwork_params(k_params, input_size, output_size)

    # Tiny RL-inference batch (single 8x128-padded tile).
    state = jax.random.normal(k_x, (8, input_size), jnp.float32)
    out = jax.block_until_ready(qnetwork_forward(state, weight, bias))
    ref = state @ weight.T + bias
    assert out.shape == (8, output_size)
    assert jnp.allclose(out, ref, atol=1e-5, rtol=1e-5)

    # Larger batch: multi-step grid, tile-divisible rows.
    big_state = jax.random.normal(k_x2, (3000, input_size), jnp.float32)
    big_out = jax.block_until_ready(qnetwork_forward(big_state, weight, bias))
    big_ref = big_state @ weight.T + bias
    assert jnp.allclose(big_out, big_ref, atol=1e-5, rtol=1e-5)

    # Batch whose padded row count is NOT a multiple of the tile: exercises the
    # ragged last grid step (no padding to a multiple of the tile).
    rag_state = jax.random.normal(k_x3, (5000, input_size), jnp.float32)
    rag_out = jax.block_until_ready(qnetwork_forward(rag_state, weight, bias))
    rag_ref = rag_state @ weight.T + bias
    assert jnp.allclose(rag_out, rag_ref, atol=1e-5, rtol=1e-5)

    print("KERNEL_OK")
</pallas_src>

<mosaic_0001>
module attributes {stable_mosaic.version = 11 : i64} {
  func.func @_linear_kernel(%arg0: i32, %arg1: memref<2x8x128xf32, #tpu.memory_space<vmem>>, %arg2: memref<4x2xf32, #tpu.memory_space<smem>>, %arg3: memref<4xf32, #tpu.memory_space<smem>>, %arg4: memref<4x8x128xf32, #tpu.memory_space<vmem>>) attributes {dimension_semantics = [#tpu.dimension_semantics<parallel>], iteration_bounds = array<i64: 1>, scalar_prefetch = 0 : i64, scratch_operands = 0 : i64, tpu.core_type = #tpu.core_type<tc>, window_params = [{transform_indices = @transform_0, window_bounds = array<i64: 2, 8, 128>}, {transform_indices = @transform_1, window_bounds = array<i64: 4, 2>}, {transform_indices = @transform_2, window_bounds = array<i64: 4>}, {transform_indices = @transform_3, window_bounds = array<i64: 4, 8, 128>}]} {
    %c0 = arith.constant 0 : index
    %c0_0 = arith.constant 0 : index
    %c0_1 = arith.constant 0 : index
    %0 = vector.load %arg1[%c0, %c0_0, %c0_1] : memref<2x8x128xf32, #tpu.memory_space<vmem>>, vector<1x8x128xf32>
    %1 = vector.shape_cast %0 : vector<1x8x128xf32> to vector<8x128xf32>
    %c1 = arith.constant 1 : index
    %c0_2 = arith.constant 0 : index
    %c0_3 = arith.constant 0 : index
    %2 = vector.load %arg1[%c1, %c0_2, %c0_3] : memref<2x8x128xf32, #tpu.memory_space<vmem>>, vector<1x8x128xf32>
    %3 = vector.shape_cast %2 : vector<1x8x128xf32> to vector<8x128xf32>
    %c0_4 = arith.constant 0 : index
    %4 = memref.load %arg3[%c0_4] : memref<4xf32, #tpu.memory_space<smem>>
    %c0_5 = arith.constant 0 : index
    %c0_6 = arith.constant 0 : index
    %5 = memref.load %arg2[%c0_5, %c0_6] : memref<4x2xf32, #tpu.memory_space<smem>>
    %6 = vector.broadcast %5 : f32 to vector<8x128xf32>
    %7 = arith.mulf %6, %1 : vector<8x128xf32>
    %8 = vector.broadcast %4 : f32 to vector<8x128xf32>
    %9 = arith.addf %8, %7 : vector<8x128xf32>
    %c0_7 = arith.constant 0 : index
    %c1_8 = arith.constant 1 : index
    %10 = memref.load %arg2[%c0_7, %c1_8] : memref<4x2xf32, #tpu.memory_space<smem>>
    %11 = vector.broadcast %10 : f32 to vector<8x128xf32>
    %12 = arith.mulf %11, %3 : vector<8x128xf32>
    %13 = arith.addf %9, %12 : vector<8x128xf32>
    %c0_9 = arith.constant 0 : index
    %c0_10 = arith.constant 0 : index
    %c0_11 = arith.constant 0 : index
    %14 = vector.load %arg4[%c0_9, %c0_10, %c0_11] : memref<4x8x128xf32, #tpu.memory_space<vmem>>, vector<1x8x128xf32>
    %15 = vector.shape_cast %14 : vector<1x8x128xf32> to vector<8x128xf32>
    %16 = vector.shape_cast %13 : vector<8x128xf32> to vector<1x8x128xf32>
    tpu.vector_store %arg4[%c0_9, %c0_10, %c0_11], %16 {strides = array<i32>} : memref<4x8x128xf32, #tpu.memory_space<vmem>>, vector<1x8x128xf32>,
    %c1_12 = arith.constant 1 : index
    %17 = memref.load %arg3[%c1_12] : memref<4xf32, #tpu.memory_space<smem>>
    %c1_13 = arith.constant 1 : index
    %c0_14 = arith.constant 0 : index
    %18 = memref.load %arg2[%c1_13, %c0_14] : memref<4x2xf32, #tpu.memory_space<smem>>
    %19 = vector.broadcast %18 : f32 to vector<8x128xf32>
    %20 = arith.mulf %19, %1 : vector<8x128xf32>
    %21 = vector.broadcast %17 : f32 to vector<8x128xf32>
    %22 = arith.addf %21, %20 : vector<8x128xf32>
    %c1_15 = arith.constant 1 : index
    %c1_16 = arith.constant 1 : index
    %23 = memref.load %arg2[%c1_15, %c1_16] : memref<4x2xf32, #tpu.memory_space<smem>>
    %24 = vector.broadcast %23 : f32 to vector<8x128xf32>
    %25 = arith.mulf %24, %3 : vector<8x128xf32>
    %26 = arith.addf %22, %25 : vector<8x128xf32>
    %c1_17 = arith.constant 1 : index
    %c0_18 = arith.constant 0 : index
    %c0_19 = arith.constant 0 : index
    %27 = vector.load %arg4[%c1_17, %c0_18, %c0_19] : memref<4x8x128xf32, #tpu.memory_space<vmem>>, vector<1x8x128xf32>
    %28 = vector.shape_cast %27 : vector<1x8x128xf32> to vector<8x128xf32>
    %29 = vector.shape_cast %26 : vector<8x128xf32> to vector<1x8x128xf32>
    tpu.vector_store %arg4[%c1_17, %c0_18, %c0_19], %29 {strides = array<i32>} : memref<4x8x128xf32, #tpu.memory_space<vmem>>, vector<1x8x128xf32>,
    %c2 = arith.constant 2 : index
    %30 = memref.load %arg3[%c2] : memref<4xf32, #tpu.memory_space<smem>>
    %c2_20 = arith.constant 2 : index
    %c0_21 = arith.constant 0 : index
    %31 = memref.load %arg2[%c2_20, %c0_21] : memref<4x2xf32, #tpu.memory_space<smem>>
    %32 = vector.broadcast %31 : f32 to vector<8x128xf32>
    %33 = arith.mulf %32, %1 : vector<8x128xf32>
    %34 = vector.broadcast %30 : f32 to vector<8x128xf32>
    %35 = arith.addf %34, %33 : vector<8x128xf32>
    %c2_22 = arith.constant 2 : index
    %c1_23 = arith.constant 1 : index
    %36 = memref.load %arg2[%c2_22, %c1_23] : memref<4x2xf32, #tpu.memory_space<smem>>
    %37 = vector.broadcast %36 : f32 to vector<8x128xf32>
    %38 = arith.mulf %37, %3 : vector<8x128xf32>
    %39 = arith.addf %35, %38 : vector<8x128xf32>
    %c2_24 = arith.constant 2 : index
    %c0_25 = arith.constant 0 : index
    %c0_26 = arith.constant 0 : index
    %40 = vector.load %arg4[%c2_24, %c0_25, %c0_26] : memref<4x8x128xf32, #tpu.memory_space<vmem>>, vector<1x8x128xf32>
    %41 = vector.shape_cast %40 : vector<1x8x128xf32> to vector<8x128xf32>
    %42 = vector.shape_cast %39 : vector<8x128xf32> to vector<1x8x128xf32>
    tpu.vector_store %arg4[%c2_24, %c0_25, %c0_26], %42 {strides = array<i32>} : memref<4x8x128xf32, #tpu.memory_space<vmem>>, vector<1x8x128xf32>,
    %c3 = arith.constant 3 : index
    %43 = memref.load %arg3[%c3] : memref<4xf32, #tpu.memory_space<smem>>
    %c3_27 = arith.constant 3 : index
    %c0_28 = arith.constant 0 : index
    %44 = memref.load %arg2[%c3_27, %c0_28] : memref<4x2xf32, #tpu.memory_space<smem>>
    %45 = vector.broadcast %44 : f32 to vector<8x128xf32>
    %46 = arith.mulf %45, %1 : vector<8x128xf32>
    %47 = vector.broadcast %43 : f32 to vector<8x128xf32>
    %48 = arith.addf %47, %46 : vector<8x128xf32>
    %c3_29 = arith.constant 3 : index
    %c1_30 = arith.constant 1 : index
    %49 = memref.load %arg2[%c3_29, %c1_30] : memref<4x2xf32, #tpu.memory_space<smem>>
    %50 = vector.broadcast %49 : f32 to vector<8x128xf32>
    %51 = arith.mulf %50, %3 : vector<8x128xf32>
    %52 = arith.addf %48, %51 : vector<8x128xf32>
    %c3_31 = arith.constant 3 : index
    %c0_32 = arith.constant 0 : index
    %c0_33 = arith.constant 0 : index
    %53 = vector.load %arg4[%c3_31, %c0_32, %c0_33] : memref<4x8x128xf32, #tpu.memory_space<vmem>>, vector<1x8x128xf32>
    %54 = vector.shape_cast %53 : vector<1x8x128xf32> to vector<8x128xf32>
    %55 = vector.shape_cast %52 : vector<8x128xf32> to vector<1x8x128xf32>
    tpu.vector_store %arg4[%c3_31, %c0_32, %c0_33], %55 {strides = array<i32>} : memref<4x8x128xf32, #tpu.memory_space<vmem>>, vector<1x8x128xf32>,
    return
  }
  func.func @transform_0(%arg0: i32) -> (i32, i32, i32) {
    %c0_i32 = arith.constant 0 : i32
    %c0_i32_0 = arith.constant 0 : i32
    %c0_i32_1 = arith.constant 0 : i32
    return %c0_i32, %arg0, %c0_i32_0 : i32, i32, i32
  }
  func.func @transform_1(%arg0: i32) -> (i32, i32) {
    %c0_i32 = arith.constant 0 : i32
    %c0_i32_0 = arith.constant 0 : i32
    %c0_i32_1 = arith.constant 0 : i32
    return %c0_i32, %c0_i32_0 : i32, i32
  }
  func.func @transform_2(%arg0: i32) -> i32 {
    %c0_i32 = arith.constant 0 : i32
    %c0_i32_0 = arith.constant 0 : i32
    return %c0_i32 : i32
  }
  func.func @transform_3(%arg0: i32) -> (i32, i32, i32) {
    %c0_i32 = arith.constant 0 : i32
    %c0_i32_0 = arith.constant 0 : i32
    %c0_i32_1 = arith.constant 0 : i32
    return %c0_i32, %arg0, %c0_i32_0 : i32, i32, i32
  }
}

</mosaic_0001>

<bundles_post_ra>
// kernel: tpu_custom_call.1
= control target key start
LH: loop header
LB: loop body
LE: loop exit
PB: predicated region body
PF: predicated region fallthrough
CT: control target
= control target key end

     0   :  { %8 = vsyncpa [#allocation3], 0  ;;  %s255_s0 = inlined_call_operand.hbm [shape: f32[2,8,128], index: 0, kind: input, shape index: {}]   ;;  %s256_s1 = inlined_call_operand.vmem [shape: f32[4,2], index: 1, kind: input, shape index: {}]   ;;  %s257_s2 = inlined_call_operand.vmem [shape: f32[4], index: 2, kind: input, shape index: {}]   ;;  %s258_s3 = inlined_call_operand.hbm [shape: f32[4,8,128], index: 3, kind: output, shape index: {}]  }
   0x1   :  { %9 = vsyncpa [#allocation5], 0 }
   0x2   :  { %10 = vsyncpa [#allocation8], 0 }
   0x3   :  { %11 = vsyncpa [#allocation4], 0  ;;  %s211_s12 = smov [#allocation2]   ;;  %s30_s16 = sshll.u32 %s256_s1, 4  ;;  %s31_s16 = int_to_ptr.vmem [resolvable:$true] %s30_s16 }
   0x4   :  { %s17_s13 = sshll.u32 %s211_s12, 4  ;;  %s18_s13 = int_to_ptr.vmem [resolvable:$true] %s17_s13 }
   0x5   :  { %s147_s17 = scalar_lea.vmem %s18_s13, 256  ;;  %p152_p1 = scmp.lt.s32.totalorder %s18_s13, %s18_s13 }
   0x6   :  { %p148_p0 = scmp.ne.s32.totalorder %s18_s13, %s147_s17  ;;  %p153_p2 = scmp.lt.s32.totalorder %s147_s17, %s147_s17 }
   0x8   :  { %p154_p3 = por %p153_p2, %p152_p1 }
   0xa   :  { %p155_p4 = pnand %p154_p3, %p148_p0 }
   0xc   :  { %158 = shalt.err (!%p155_p4)
}
   0xd   :  { %s212_s18 = smov 128   ;;  %s213_s19 = smov 8  }
   0xe   :  { %23 = dma.hbm_to_vmem [thread:$0]  %s255_s0, 256, %s18_s13, [#allocation3], %s212_s18, %s212_s18, %s213_s19  }
   0xf   :  { %s159_s22 = scalar_lea.vmem %s31_s16, 64  ;;  %p164_p6 = scmp.lt.s32.totalorder %s31_s16, %s31_s16 }
  0x10   :  { %p160_p5 = scmp.ne.s32.totalorder %s31_s16, %s159_s22  ;;  %p165_p7 = scmp.lt.s32.totalorder %s159_s22, %s159_s22 }
  0x12   :  { %p166_p8 = por %p165_p7, %p164_p6 }
  0x14   :  { %p167_p9 = pnand %p166_p8, %p160_p5 }
  0x16   :  { %170 = shalt.err (!%p167_p9)
}
  0x17   :  { %s214_s1 = smov [#allocation6]   ;;  %s40_s25 = sshll.u32 %s257_s2, 4  ;;  %s41_s25 = int_to_ptr.vmem [resolvable:$true] %s40_s25 }
  0x18   :  { %33 = dma.vmem_to_smem %s31_s16, 64, %s214_s1, [#allocation5]  }
  0x19   :  { %s171_s26 = scalar_lea.vmem %s41_s25, 16  ;;  %p176_p11 = scmp.lt.s32.totalorder %s41_s25, %s41_s25 }
  0x1a   :  { %p172_p10 = scmp.ne.s32.totalorder %s41_s25, %s171_s26  ;;  %p177_p12 = scmp.lt.s32.totalorder %s171_s26, %s171_s26 }
  0x1c   :  { %p178_p13 = por %p177_p12, %p176_p11 }
  0x1e   :  { %p179_p0 = pnand %p178_p13, %p172_p10 }
  0x20   :  { %182 = shalt.err (!%p179_p0)
}
  0x21   :  { %s215_s0 = smov [#allocation7]  }
  0x22   :  { %43 = dma.vmem_to_smem %s41_s25, 16, %s215_s0, [#allocation8]  }
  0x23   :  { %203 = dma.done.wait [#allocation3], 256  }
  0x24   :  { %204 = vsyncadd [#allocation3], 4294967040 }
  0x25   :  { %205 = dma.done.wait [#allocation5], 64  }
  0x26   :  { %206 = vsyncadd [#allocation5], 4294967232 }
  0x27   :  { %207 = dma.done.wait [#allocation8], 16  }
  0x28   :  { %208 = vsyncadd [#allocation8], 4294967280 }
  0x29   :  { %53 = sfence }
  0x2a   :  { %s57_s27 = sld [smem:[#allocation7]]  ;;  %v54_v0 = vld [vmem:[#allocation2] sm:$0xff]  ;;  %v56_v1 = vld [vmem:[#allocation2 + $0x8] sm:$0xff]  ;;  %s216_s11 = smov [#allocation9]  }
  0x2b   :  { %s58_s28 = sld [smem:[#allocation6]]  ;;  %s109_s12 = sshll.u32 %s216_s11, 4  ;;  %s110_s12 = int_to_ptr.vmem [resolvable:$true] %s109_s12 }
  0x2c   :  { %s123_s2 = sld [smem:[#allocation6 + $0x1]]  ;;  %s183_s13 = scalar_lea.vmem %s110_s12, 512 }
  0x2d   :  { %s124_s29 = sld [smem:[#allocation7 + $0x1]]  ;;  %p184_p1 = scmp.ne.s32.totalorder %s110_s12, %s183_s13 }
  0x2e   :  { %s125_s30 = sld [smem:[#allocation6 + $0x80]]  ;;  %p188_p2 = scmp.lt.s32.totalorder %s110_s12, %s110_s12 }
  0x2f   :  { %s126_s4 = sld [smem:[#allocation6 + $0x81]]  ;;  %p189_p3 = scmp.lt.s32.totalorder %s183_s13, %s183_s13 }
  0x30   :  { %s127_s5 = sld [smem:[#allocation7 + $0x2]]  ;;  %v61_v3 = vstv %s57_s27 }
  0x31   :  { %v59_v2 = vstv %s58_s28  ;;  %s128_s6 = sld [smem:[#allocation6 + $0x100]]  ;;  %p190_p4 = por %p189_p3, %p188_p2 }
  0x32   :  { %v60_v4 = vmul.f32 %v59_v2, %v54_v0  ;;  %v64_v5 = vstv %s123_s2  ;;  %s129_s7 = sld [smem:[#allocation6 + $0x101]] }
  0x33   :  { %v65_v6 = vmul.f32 %v64_v5, %v56_v1  ;;  %s130_s8 = sld [smem:[#allocation7 + $0x3]]  ;;  %v72_v9 = vstv %s124_s29  ;;  %p191_p5 = pnand %p190_p4, %p184_p1 }
  0x34   :  { %v62_v7 = vadd.f32 %v61_v3, %v60_v4  ;;  %v70_v8 = vstv %s125_s30  ;;  %s131_s9 = sld [smem:[#allocation6 + $0x180]] }
  0x35   :  { %v71_v10 = vmul.f32 %v70_v8, %v54_v0  ;;  %v75_v11 = vstv %s126_s4  ;;  %s132_s10 = sld [smem:[#allocation6 + $0x181]] }
  0x36   :  { %v66_v12 = vadd.f32 %v65_v6, %v62_v7  ;;  %v76_v13 = vmul.f32 %v75_v11, %v56_v1  ;;  %v84_v16 = vstv %s127_s5 }
  0x37   :  { %v73_v14 = vadd.f32 %v72_v9, %v71_v10  ;;  %v82_v15 = vstv %s128_s6 }
  0x38   :  { %67 = vst [vmem:[#allocation9] sm:$0xff] %v66_v12  ;;  %v83_v17 = vmul.f32 %v82_v15, %v54_v0  ;;  %v87_v18 = vstv %s129_s7 }
  0x39   :  { %v77_v19 = vadd.f32 %v76_v13, %v73_v14  ;;  %v88_v20 = vmul.f32 %v87_v18, %v56_v1  ;;  %v96_v23 = vstv %s130_s8 }
  0x3a   :  { %v85_v21 = vadd.f32 %v84_v16, %v83_v17  ;;  %v94_v22 = vstv %s131_s9 }
  0x3b   :  { %79 = vst [vmem:[#allocation9 + $0x8] sm:$0xff] %v77_v19  ;;  %v95_v24 = vmul.f32 %v94_v22, %v54_v0  ;;  %v99_v25 = vstv %s132_s10 }
  0x3c   :  { %v89_v26 = vadd.f32 %v88_v20, %v85_v21  ;;  %v100_v27 = vmul.f32 %v99_v25, %v56_v1 }
  0x3d   :  { %v97_v28 = vadd.f32 %v96_v23, %v95_v24 }
  0x3e   :  { %91 = vst [vmem:[#allocation9 + $0x10] sm:$0xff] %v89_v26 }
  0x3f   :  { %v101_v29 = vadd.f32 %v100_v27, %v97_v28 }
  0x41   :  { %103 = vst [vmem:[#allocation9 + $0x18] sm:$0xff] %v101_v29 }
  0x42   :  { %194 = shalt.err (!%p191_p5)
}
  0x43   :  { %115 = dma.vmem_to_hbm [thread:$0]  %s110_s12, 512, %s258_s3, [#allocation4], %s212_s18, %s212_s18, %s213_s19  }
  0x44   :  { %209 = dma.done.wait [#allocation4], 512  }
  0x45   :  { %210 = vsyncadd [#allocation4], 4294966784 }
  0x46   :  { %119 = vsyncpa [#allocation3], 1 }
  0x47   :  { %120 = vsyncpa [#allocation4], 1 }
  0x48   :  { %121 = vsyncpa [#allocation5], 1 }
  0x49   :  { %122 = vsyncpa [#allocation8], 1 }

</bundles_post_ra>
